<compile_context>
chip_gen: v6e
topology: v6e:2x2x1
jax: 0.10.0
libtpu: 0.0.40
codegen_flags: <defaults>
</compile_context>

<pallas_src>
import functools

import jax
import jax.numpy as jnp
from jax.experimental import pallas as pl
from jax.experimental.pallas import tpu as pltpu

LN_EPS = 1e-12  # BERT default layer_norm_eps


# ---------------------------------------------------------------------------
# Pallas kernel: one (TM, D) slab of rows per grid step
# ---------------------------------------------------------------------------

def _self_output_kernel(h_ref, x_ref, w_ref, b_ref, g_ref, beta_ref, out_ref, *, eps):
    """dense(h) + bias + residual(x) + LayerNorm, fused, for a (TM, D) row tile."""
    # Dense projection: bf16 MXU operands (h streamed as bf16), f32 accumulation.
    y = jnp.dot(h_ref[...], w_ref[...], preferred_element_type=jnp.float32)
    y = y + b_ref[...] + x_ref[...].astype(jnp.float32)   # bias + residual (dropout = identity)

    # LayerNorm over the hidden (lane) axis — single sweep for mean / mean-of-squares,
    # then one fused per-row scale/shift FMA over the tile.
    mean = jnp.mean(y, axis=-1, keepdims=True)
    mean_sq = jnp.mean(y * y, axis=-1, keepdims=True)
    var = jnp.maximum(mean_sq - mean * mean, 0.0)
    inv = jax.lax.rsqrt(var + eps)                          # (TM, 1)
    scale = inv * g_ref[...]                                # (TM, D)
    shift = beta_ref[...] - mean * scale                    # (TM, D)
    out_ref[...] = (y * scale + shift).astype(out_ref.dtype)


# ---------------------------------------------------------------------------
# Row-tile selection: no padding when B*L divides nicely, prefer even grid steps
# ---------------------------------------------------------------------------

def _pick_row_tile(n_rows, cap=512):
    """Return (row_tile, needs_pad). Tile is a multiple of 8 (or the full extent)."""
    if n_rows % 8 != 0:
        if n_rows <= cap:
            return n_rows, False          # full-extent block: legal, no pad, 1 step
        tm = (pl.next_power_of_2(pl.cdiv(n_rows, 2)) // 8) * 8
        return max(8, min(cap, tm)), True  # rare ragged case: pad
    # n_rows is a multiple of 8: take the largest multiple-of-8 divisor <= cap,
    # preferring an even step count >= 2 (v7x megacore), then any >= 2, then 1.
    best_even = best_multi = best_any = None
    t = min(cap, n_rows)
    t -= t % 8
    while t >= 8:
        if n_rows % t == 0:
            steps = n_rows // t
            if best_any is None:
                best_any = t
            if steps >= 2 and best_multi is None:
                best_multi = t
            if steps >= 2 and steps % 2 == 0:
                best_even = t
                break
        t -= 8
    return (best_even or best_multi or best_any), False


# ---------------------------------------------------------------------------
# pallas_call wrapper
# ---------------------------------------------------------------------------

def _as_row(p):
    return p.reshape(1, -1)


def bert_self_output(hidden_states, input_tensor, params, *, eps=LN_EPS, out_dtype=None):
    """hidden_states, input_tensor: (B, L, D) -> LayerNorm(hidden @ W + b + input)."""
    B, L, D = hidden_states.shape
    if out_dtype is None:
        out_dtype = hidden_states.dtype
    n = B * L
    tm, needs_pad = _pick_row_tile(n)
    n_rows = pl.cdiv(n, tm) * tm if needs_pad else n

    # hidden is consumed only as an MXU bf16 operand -> stream it as bf16 (half the bytes).
    h2 = hidden_states.reshape(n, D).astype(jnp.bfloat16)
    x2 = input_tensor.reshape(n, D)
    if needs_pad:  # rare ragged shapes only
        pad = ((0, n_rows - n), (0, 0))
        h2 = jnp.pad(h2, pad)
        x2 = jnp.pad(x2, pad)

    # bf16 weight residency: halves weight DMA bytes / VMEM footprint.
    w_bf16 = params["w"].astype(jnp.bfloat16)
    b = _as_row(params["b"].astype(jnp.float32))
    ln_g = _as_row(params["ln_g"].astype(jnp.float32))
    ln_b = _as_row(params["ln_b"].astype(jnp.float32))

    out_itemsize = jnp.dtype(out_dtype).itemsize
    cost = pl.CostEstimate(
        flops=int(2 * n_rows * D * D + 10 * n_rows * D),
        transcendentals=int(n_rows),                      # one rsqrt per row
        bytes_accessed=int(h2.size * h2.dtype.itemsize
                           + x2.size * x2.dtype.itemsize
                           + n_rows * D * out_itemsize
                           + w_bf16.size * w_bf16.dtype.itemsize
                           + 3 * D * 4),
    )

    kernel = functools.partial(_self_output_kernel, eps=eps)
    out = pl.pallas_call(
        kernel,
        out_shape=jax.ShapeDtypeStruct((n_rows, D), out_dtype),
        grid=(n_rows // tm,),
        in_specs=[
            pl.BlockSpec((tm, D), lambda i: (i, 0)),   # hidden_states rows (bf16)
            pl.BlockSpec((tm, D), lambda i: (i, 0)),   # residual input rows
            pl.BlockSpec((D, D), lambda i: (0, 0)),    # dense weight (bf16, resident)
            pl.BlockSpec((1, D), lambda i: (0, 0)),    # dense bias
            pl.BlockSpec((1, D), lambda i: (0, 0)),    # LayerNorm gamma
            pl.BlockSpec((1, D), lambda i: (0, 0)),    # LayerNorm beta
        ],
        out_specs=pl.BlockSpec((tm, D), lambda i: (i, 0)),
        compiler_params=pltpu.CompilerParams(
            dimension_semantics=("parallel",)),
        cost_estimate=cost,
    )(h2, x2, w_bf16, b, ln_g, ln_b)

    if needs_pad:
        out = out[:n]
    return out.reshape(B, L, D)


# ---------------------------------------------------------------------------
# Pure-JAX references
# ---------------------------------------------------------------------------

def _ref_layer_norm(y, g, b, eps):
    mean = jnp.mean(y, axis=-1, keepdims=True)
    var = jnp.mean(jnp.square(y - mean), axis=-1, keepdims=True)
    return (y - mean) * jax.lax.rsqrt(var + eps) * g + b


def ref_self_output_f32(hidden_states, input_tensor, params, eps=LN_EPS):
    """True module semantics, full f32 matmul."""
    y = (jnp.dot(hidden_states, params["w"], preferred_element_type=jnp.float32)
         + params["b"].reshape(1, 1, -1) + input_tensor)
    return _ref_layer_norm(y, params["ln_g"].reshape(1, 1, -1),
                           params["ln_b"].reshape(1, 1, -1), eps)


def ref_self_output_bf16(hidden_states, input_tensor, params, eps=LN_EPS):
    """Same bf16-operand / f32-accumulate matmul as the kernel (checks the fusion)."""
    y = jnp.dot(hidden_states.astype(jnp.bfloat16),
                params["w"].astype(jnp.bfloat16),
                preferred_element_type=jnp.float32)
    y = y + params["b"].reshape(1, 1, -1) + input_tensor
    return _ref_layer_norm(y, params["ln_g"].reshape(1, 1, -1),
                           params["ln_b"].reshape(1, 1, -1), eps)


# ---------------------------------------------------------------------------
# Deterministic toy test
# ---------------------------------------------------------------------------

if __name__ == "__main__":
    key = jax.random.PRNGKey(0)
    B, L, D = 2, 8, 32
    k_h, k_x, k_w, k_b, k_g, k_bt = jax.random.split(key, 6)

    # torch-style parameter shapes: bias / gamma / beta are (D,)
    params = dict(
        w=0.05 * jax.random.normal(k_w, (D, D), jnp.float32),   # (in, out): y = x @ W + b
        b=0.05 * jax.random.normal(k_b, (D,), jnp.float32),
        ln_g=1.0 + 0.1 * jax.random.normal(k_g, (D,), jnp.float32),
        ln_b=0.1 * jax.random.normal(k_bt, (D,), jnp.float32),
    )
    hidden = jax.random.normal(k_h, (B, L, D), jnp.float32)   # self-attention output
    resid = jax.random.normal(k_x, (B, L, D), jnp.float32)    # residual (input_tensor)

    out = bert_self_output(hidden, resid, params)
    jax.block_until_ready(out)

    ref_bf = ref_self_output_bf16(hidden, resid, params)   # matches kernel matmul math
    ref_32 = ref_self_output_f32(hidden, resid, params)    # true module semantics

    err_exact = float(jnp.max(jnp.abs(out - ref_bf)))
    err_f32 = float(jnp.max(jnp.abs(out - ref_32)))
    assert err_exact < 5e-4, f"fusion mismatch vs bf16-matched reference: {err_exact}"
    assert err_f32 < 2e-2, f"mismatch vs f32 reference: {err_f32}"

    print("KERNEL_OK")
</pallas_src>

<mosaic_0001>
module attributes {stable_mosaic.version = 11 : i64} {
  func.func @_self_output_kernel(%arg0: i32, %arg1: memref<8x32xbf16, #tpu.memory_space<vmem>>, %arg2: memref<8x32xf32, #tpu.memory_space<vmem>>, %arg3: memref<32x32xbf16, #tpu.memory_space<vmem>>, %arg4: memref<1x32xf32, #tpu.memory_space<vmem>>, %arg5: memref<1x32xf32, #tpu.memory_space<vmem>>, %arg6: memref<1x32xf32, #tpu.memory_space<vmem>>, %arg7: memref<8x32xf32, #tpu.memory_space<vmem>>) attributes {dimension_semantics = [#tpu.dimension_semantics<parallel>], iteration_bounds = array<i64: 2>, scalar_prefetch = 0 : i64, scratch_operands = 0 : i64, tpu.core_type = #tpu.core_type<tc>, window_params = [{transform_indices = @transform_0, window_bounds = array<i64: 8, 32>}, {transform_indices = @transform_1, window_bounds = array<i64: 8, 32>}, {pipeline_mode = #tpu.pipeline_mode<synchronous>, transform_indices = @transform_2, window_bounds = array<i64: 32, 32>}, {pipeline_mode = #tpu.pipeline_mode<synchronous>, transform_indices = @transform_3, window_bounds = array<i64: 1, 32>}, {pipeline_mode = #tpu.pipeline_mode<synchronous>, transform_indices = @transform_4, window_bounds = array<i64: 1, 32>}, {pipeline_mode = #tpu.pipeline_mode<synchronous>, transform_indices = @transform_5, window_bounds = array<i64: 1, 32>}, {transform_indices = @transform_6, window_bounds = array<i64: 8, 32>}]} {
    %c0 = arith.constant 0 : index
    %c0_0 = arith.constant 0 : index
    %0 = vector.load %arg1[%c0, %c0_0] : memref<8x32xbf16, #tpu.memory_space<vmem>>, vector<8x32xbf16>
    %c0_1 = arith.constant 0 : index
    %c0_2 = arith.constant 0 : index
    %1 = vector.load %arg3[%c0_1, %c0_2] : memref<32x32xbf16, #tpu.memory_space<vmem>>, vector<32x32xbf16>
    %cst = arith.constant dense<0.000000e+00> : vector<8x32xf32>
    %2 = tpu.matmul %0, %1, %cst {dimension_numbers = #tpu.dot_dimension_numbers<[1], [0], [0], [1], [0, 0, 1, 1], [], []>} : vector<8x32xbf16>, vector<32x32xbf16>, vector<8x32xf32> -> vector<8x32xf32>
    %c0_3 = arith.constant 0 : index
    %c0_4 = arith.constant 0 : index
    %3 = vector.load %arg4[%c0_3, %c0_4] : memref<1x32xf32, #tpu.memory_space<vmem>>, vector<1x32xf32>
    %4 = vector.broadcast %3 : vector<1x32xf32> to vector<8x32xf32>
    %5 = arith.addf %2, %4 : vector<8x32xf32>
    %c0_5 = arith.constant 0 : index
    %c0_6 = arith.constant 0 : index
    %6 = vector.load %arg2[%c0_5, %c0_6] : memref<8x32xf32, #tpu.memory_space<vmem>>, vector<8x32xf32>
    %7 = arith.addf %5, %6 : vector<8x32xf32>
    %cst_7 = arith.constant dense<0.000000e+00> : vector<8xf32>
    %8 = vector.multi_reduction <add>, %7, %cst_7 [1] : vector<8x32xf32> to vector<8xf32>
    %9 = vector.shape_cast %8 : vector<8xf32> to vector<8x1xf32>
    %cst_8 = arith.constant 3.200000e+01 : f32
    %10 = vector.broadcast %cst_8 : f32 to vector<8x1xf32>
    %11 = arith.divf %9, %10 : vector<8x1xf32>
    %12 = arith.mulf %7, %7 : vector<8x32xf32>
    %cst_9 = arith.constant dense<0.000000e+00> : vector<8xf32>
    %13 = vector.multi_reduction <add>, %12, %cst_9 [1] : vector<8x32xf32> to vector<8xf32>
    %14 = vector.shape_cast %13 : vector<8xf32> to vector<8x1xf32>
    %cst_10 = arith.constant 3.200000e+01 : f32
    %15 = vector.broadcast %cst_10 : f32 to vector<8x1xf32>
    %16 = arith.divf %14, %15 : vector<8x1xf32>
    %17 = arith.mulf %11, %11 : vector<8x1xf32>
    %18 = arith.subf %16, %17 : vector<8x1xf32>
    %cst_11 = arith.constant 0.000000e+00 : f32
    %19 = vector.broadcast %cst_11 : f32 to vector<8x1xf32>
    %20 = arith.maximumf %18, %19 : vector<8x1xf32>
    %cst_12 = arith.constant 9.99999996E-13 : f32
    %21 = vector.broadcast %cst_12 : f32 to vector<8x1xf32>
    %22 = arith.addf %20, %21 : vector<8x1xf32>
    %23 = math.rsqrt %22 : vector<8x1xf32>
    %c0_13 = arith.constant 0 : index
    %c0_14 = arith.constant 0 : index
    %24 = vector.load %arg5[%c0_13, %c0_14] : memref<1x32xf32, #tpu.memory_space<vmem>>, vector<1x32xf32>
    %25 = vector.broadcast %23 : vector<8x1xf32> to vector<8x32xf32>
    %26 = vector.broadcast %24 : vector<1x32xf32> to vector<8x32xf32>
    %27 = arith.mulf %25, %26 : vector<8x32xf32>
    %c0_15 = arith.constant 0 : index
    %c0_16 = arith.constant 0 : index
    %28 = vector.load %arg6[%c0_15, %c0_16] : memref<1x32xf32, #tpu.memory_space<vmem>>, vector<1x32xf32>
    %29 = vector.broadcast %11 : vector<8x1xf32> to vector<8x32xf32>
    %30 = arith.mulf %29, %27 : vector<8x32xf32>
    %31 = vector.broadcast %28 : vector<1x32xf32> to vector<8x32xf32>
    %32 = arith.subf %31, %30 : vector<8x32xf32>
    %33 = arith.mulf %7, %27 : vector<8x32xf32>
    %34 = arith.addf %33, %32 : vector<8x32xf32>
    %c0_17 = arith.constant 0 : index
    %c0_18 = arith.constant 0 : index
    %35 = vector.load %arg7[%c0_17, %c0_18] : memref<8x32xf32, #tpu.memory_space<vmem>>, vector<8x32xf32>
    tpu.vector_store %arg7[%c0_17, %c0_18], %34 {strides = array<i32>} : memref<8x32xf32, #tpu.memory_space<vmem>>, vector<8x32xf32>,
    return
  }
  func.func @transform_0(%arg0: i32) -> (i32, i32) {
    %c0_i32 = arith.constant 0 : i32
    %c0_i32_0 = arith.constant 0 : i32
    return %arg0, %c0_i32 : i32, i32
  }
  func.func @transform_1(%arg0: i32) -> (i32, i32) {
    %c0_i32 = arith.constant 0 : i32
    %c0_i32_0 = arith.constant 0 : i32
    return %arg0, %c0_i32 : i32, i32
  }
  func.func @transform_2(%arg0: i32) -> (i32, i32) {
    %c0_i32 = arith.constant 0 : i32
    %c0_i32_0 = arith.constant 0 : i32
    %c0_i32_1 = arith.constant 0 : i32
    return %c0_i32, %c0_i32_0 : i32, i32
  }
  func.func @transform_3(%arg0: i32) -> (i32, i32) {
    %c0_i32 = arith.constant 0 : i32
    %c0_i32_0 = arith.constant 0 : i32
    %c0_i32_1 = arith.constant 0 : i32
    return %c0_i32, %c0_i32_0 : i32, i32
  }
  func.func @transform_4(%arg0: i32) -> (i32, i32) {
    %c0_i32 = arith.constant 0 : i32
    %c0_i32_0 = arith.constant 0 : i32
    %c0_i32_1 = arith.constant 0 : i32
    return %c0_i32, %c0_i32_0 : i32, i32
  }
  func.func @transform_5(%arg0: i32) -> (i32, i32) {
    %c0_i32 = arith.constant 0 : i32
    %c0_i32_0 = arith.constant 0 : i32
    %c0_i32_1 = arith.constant 0 : i32
    return %c0_i32, %c0_i32_0 : i32, i32
  }
  func.func @transform_6(%arg0: i32) -> (i32, i32) {
    %c0_i32 = arith.constant 0 : i32
    %c0_i32_0 = arith.constant 0 : i32
    return %arg0, %c0_i32 : i32, i32
  }
}

</mosaic_0001>

<bundles_post_ra>
// kernel: tpu_custom_call.1
= control target key start
LH: loop header
LB: loop body
LE: loop exit
PB: predicated region body
PF: predicated region fallthrough
CT: control target
= control target key end

     0   :  { %s1058_s0 = inlined_call_operand.hbm [shape: bf16[16,32], index: 0, kind: input, shape index: {}]   ;;  %s1059_s1 = inlined_call_operand.hbm [shape: f32[16,32], index: 1, kind: input, shape index: {}]   ;;  %s1060_s2 = inlined_call_operand.hbm [shape: bf16[32,32], index: 2, kind: input, shape index: {}]   ;;  %s1061_s3 = inlined_call_operand.vmem [shape: f32[1,32], index: 3, kind: input, shape index: {}]   ;;  %s1062_s4 = inlined_call_operand.vmem [shape: f32[1,32], index: 4, kind: input, shape index: {}]   ;;  %s1063_s5 = inlined_call_operand.vmem [shape: f32[1,32], index: 5, kind: input, shape index: {}]   ;;  %s1064_s6 = inlined_call_operand.hbm [shape: f32[16,32], index: 6, kind: output, shape index: {}]  }
   0x1   :  { %1069 = sst [smem:[#allocation13_spill]] %s1058_s0 }
   0x2   :  { %1070 = sst [smem:[#allocation14_spill]] %s1060_s2 }
   0x3   :  { %11 = vsyncpa [#allocation3], 0 }
   0x4   :  { %13 = vsyncpa [#allocation3 + $0x1], 0 }
   0x5   :  { %14 = vsyncpa [#allocation6], 0 }
   0x6   :  { %16 = vsyncpa [#allocation6 + $0x1], 0 }
   0x7   :  { %17 = vsyncpa [#allocation4], 0 }
   0x8   :  { %19 = vsyncpa [#allocation4 + $0x1], 0  ;;  %s843_s21 = smov 0   ;;  %s845_s22 = smov 0  }
   0x9   :  { %s847_s23 = smov 0   ;;  %s849_s24 = smov 0  }
   0xa LB: > { %s864_s25 = sadd.s32 4294967295, %s798_s24   ;;  %s540_s26 = sadd.s32 4294967294, %s798_s24   ;;  %s798_s24 = sphi %s849_s24, %s1091_s24   ;;  %s794_s23 = sphi %s847_s23, %s1090_s23   ;;  %s790_s22 = sphi %s845_s22, %s1089_s22   ;;  %s786_s21 = sphi %s843_s21, %s1088_s21  }
   0xb   : > { %p45_p0 = scmp.ne.s32.totalorder %s790_s22, %s786_s21  ;;  %p1065_p1 = scmp.eq.s32.totalorder %s864_s25, 0 }
   0xc   : > { %p185_p3 = scmp.eq.s32.totalorder %s540_s26, 1  ;;  %p541_p5 = scmp.ge.s32.totalorder %s798_s24, 1 }
   0xd   : > { %p873_p4 = por %p1065_p1, %p45_p0  ;;  %p192_p7 = scmp.lt.s32.totalorder %s798_s24, 3 }
   0xe   : > { %p878_p6 = por %p185_p3, %p45_p0  ;;  %s800_s30 = smov [#allocation7]  }
   0xf   : > { %s1071_s27 = scalar_select %p873_p4, 1, 0 }
  0x10   : > { %s1072_s28 = scalar_select %p878_p6, 1, 0 }
  0x11   : > { %p883_p8 = pnand %p541_p5, %p192_p7  ;;  %s204_s7 = sshll.u32 %s800_s30, 4  ;;  %s205_s7 = int_to_ptr.vmem [resolvable:$true] %s204_s7 }
  0x12   : > { %s897_s9 = sadd.s32 1, %s798_s24   ;;  %s32_s10 = sadd.s32 1, %s794_s23 }
  0x13   : > { %s1073_s29 = scalar_select %p883_p8, 1, 0 }
  0x14   : > { %p584_p9 = pneg %p883_p8  ;;  %s29_s11 = ssub.s32 %s798_s24, %s897_s9 }
  0x15   : > { %s655_s12 = scalar_lea.vmem %s205_s7, 256  ;;  %p663_p5 = scmp.lt.s32.totalorder %s205_s7, %s205_s7 }
  0x16   : > { %p892_p11 = pnand %p584_p9, %p1065_p1  ;;  %p656_p13 = scmp.ne.s32.totalorder %s205_s7, %s655_s12 }
  0x17   : > { %p664_p7 = scmp.lt.s32.totalorder %s655_s12, %s655_s12 }
  0x18   : > { %p646_p12 = pneg %p892_p11 }
  0x19   : > { %p665_p10 = por %p664_p7, %p663_p5 }
  0x1a   : > { %p658_p0 = pnand %p656_p13, %p646_p12 }
  0x1c   : > { %p659_p3 = pneg %p658_p0 }
  0x1e   : > { %p666_p2 = pnand %p665_p10, %p659_p3 }
  0x20   : > { %669 = shalt.err (!%p666_p2)
}
  0x21   : > { %s801_s13 = smov 64   ;;  %s802_s14 = smov 4  }
  0x22   : > { %s1075_s2 = sld [smem:[#allocation14_spill]]  ;;  %p30_p9 = scmp.eq.s32.totalorder %s29_s11, 0 }
  0x23   : > { %p39_p10 = scmp.ne.s32.totalorder %s794_s23, %s790_s22  ;;  %p40_p2 = scmp.eq.s32.totalorder %s798_s24, 0 }
  0x24   : > { %p600_p12 = scmp.lt.s32.totalorder %s798_s24, 2  ;;  %p1076_p0 = scmp.eq.s32.totalorder %s864_s25, 1 }
  0x25   : > { %s914_s17 = scalar_select %p30_p9, %s794_s23, %s32_s10  }
  0x26   : > { %p41_p13 = por %p40_p2, %p39_p10  ;;  %p918_p3 = por %p1076_p0, %p39_p10 }
  0x27   : > { %s923_s19 = sand.u32 1, %s794_s23   ;;  %s545_s20 = sshll.u32 %s798_s24, 6 }
  0x28   : > { %587 = dma.hbm_to_vmem [thread:$0]  (!%p892_p11), %s1075_s2, 256, %s205_s7, [#allocation6], %s801_s13, %s801_s13, %s802_s14  }
  0x29   : > { %s1077_s18 = scalar_select %p918_p3, 1, 0 }
  0x2a   : > { %s544_s26 = sshll.u32 %s923_s19, 2  ;;  %s1078_s0 = sld [smem:[#allocation13_spill]] }
  0x2b   : > { %s231_s10 = scalar_lea.vmem [#allocation2], %s544_s26  ;;  %p932_p11 = pnand %p600_p12, %p41_p13 }
  0x2c   : > { %s238_s11 = sshll.u32 %s231_s10, 4  ;;  %s228_s14 = scalar_lea.sflag [#allocation3], %s923_s19  ;;  %s239_s11 = int_to_ptr.vmem [resolvable:$true] %s238_s11 }
  0x2d   : > { %p672_p7 = pneg %p932_p11 }
  0x30   : > { %s930_s8 = scalar_lea.hbm %s1078_s0, %s545_s20  ;;  %s675_s26 = scalar_lea.hbm %s1078_s0, 128 }
  0x31   : > { %s670_s15 = scalar_lea.hbm %s930_s8, 64  ;;  %p676_p2 = scmp.lt.s32.totalorder %s930_s8, %s1078_s0 }
  0x32   : > { %p671_p5 = scmp.ne.s32.totalorder %s930_s8, %s670_s15  ;;  %p677_p12 = scmp.lt.s32.totalorder %s675_s26, %s670_s15 }
  0x34   : > { %p673_p9 = pnand %p672_p7, %p671_p5  ;;  %p678_p13 = por %p677_p12, %p676_p2 }
  0x36   : > { %p674_p10 = pneg %p673_p9 }
  0x38   : > { %p679_p0 = pnand %p678_p13, %p674_p10 }
  0x3a   : > { %682 = shalt.err (!%p679_p0)
}
  0x3b   : > { %s683_s10 = scalar_lea.vmem %s239_s11, 64  ;;  %s803_s13 = smov [#allocation2]  }
  0x3c   : > { %p684_p1 = scmp.ne.s32.totalorder %s239_s11, %s683_s10  ;;  %s688_s2 = sshll.u32 %s803_s13, 4  ;;  %s689_s2 = int_to_ptr.vmem [resolvable:$false] %s688_s2 }
  0x3d   : > { %s690_s16 = scalar_lea.vmem %s689_s2, 128  ;;  %p691_p9 = scmp.lt.s32.totalorder %s239_s11, %s689_s2 }
  0x3e   : > { %p686_p6 = pnand %p684_p1, %p672_p7  ;;  %p692_p3 = scmp.lt.s32.totalorder %s690_s16, %s683_s10 }
  0x40   : > { %p687_p5 = pneg %p686_p6  ;;  %p693_p4 = por %p692_p3, %p691_p9 }
  0x42   : > { %p694_p8 = pnand %p693_p4, %p687_p5 }
  0x44   : > { %697 = shalt.err (!%p694_p8)
}
  0x45   : > { %591 = dma.hbm_to_vmem [thread:$0]  (!%p932_p11), %s930_s8, 64, %s239_s11, %s228_s14  }
  0x46   : > { %s546_s15 = sshll.u32 %s923_s19, 3  ;;  %s547_s20 = sshll.u32 %s798_s24, 7 }
  0x47   : > { %s963_s13 = scalar_lea.hbm %s1059_s1, %s547_s20  ;;  %s249_s2 = scalar_lea.vmem [#allocation5], %s546_s15 }
  0x48   : > { %s256_s7 = sshll.u32 %s249_s2, 4  ;;  %s1080_s10 = sand.u32 1, %s798_s24   ;;  %s257_s7 = int_to_ptr.vmem [resolvable:$true] %s256_s7 }
  0x49   : > { %s246_s16 = scalar_lea.sflag [#allocation6], %s1080_s10  ;;  %s698_s0 = scalar_lea.hbm %s963_s13, 128 }
  0x4a   : > { %p699_p1 = scmp.ne.s32.totalorder %s963_s13, %s698_s0  ;;  %s703_s11 = scalar_lea.hbm %s1059_s1, 256 }
  0x4b   : > { %p704_p8 = scmp.lt.s32.totalorder %s963_s13, %s1059_s1  ;;  %p705_p3 = scmp.lt.s32.totalorder %s703_s11, %s698_s0 }
  0x4c   : > { %p701_p4 = pnand %p699_p1, %p672_p7 }
  0x4d   : > { %p706_p10 = por %p705_p3, %p704_p8 }
  0x4e   : > { %p702_p6 = pneg %p701_p4 }
  0x50   : > { %p707_p2 = pnand %p706_p10, %p702_p6 }
  0x52   : > { %710 = shalt.err (!%p707_p2)
}
  0x53   : > { %s711_s15 = scalar_lea.vmem %s257_s7, 128  ;;  %s804_s26 = smov [#allocation5]  }
  0x54   : > { %p712_p12 = scmp.ne.s32.totalorder %s257_s7, %s711_s15  ;;  %s716_s30 = sshll.u32 %s804_s26, 4  ;;  %s717_s30 = int_to_ptr.vmem [resolvable:$false] %s716_s30 }
  0x55   : > { %s718_s2 = scalar_lea.vmem %s717_s30, 256  ;;  %p719_p5 = scmp.lt.s32.totalorder %s257_s7, %s717_s30 }
  0x56   : > { %p714_p13 = pnand %p712_p12, %p672_p7  ;;  %p720_p9 = scmp.lt.s32.totalorder %s718_s2, %s711_s15 }
  0x58   : > { %p715_p0 = pneg %p714_p13  ;;  %p721_p1 = por %p720_p9, %p719_p5 }
  0x5a   : > { %p722_p4 = pnand %p721_p1, %p715_p0 }
  0x5c   : > { %725 = shalt.err (!%p722_p4)
}
  0x5d   : > { %594 = dma.hbm_to_vmem [thread:$0]  (!%p932_p11), %s963_s13, 128, %s257_s7, %s246_s16  }
  0x5e   : > { %p1081_p6 = scmp.ne.s32.totalorder %s1073_s29, 0 }
  0x5f   : > { %s988_s0 = sand.u32 (!%p1081_p6), 1, %s790_s22   ;;  %p1082_p7 = scmp.ne.s32.totalorder (!%p1081_p6), %s1071_s27, 0 }
  0x60   : > { %265 = sbr.rel (%p1081_p6) target bundleno = 500 (0x1f4), region = 44  ;;  %s549_s10 = sshll.u32 (!%p1081_p6), %s988_s0, 2 }
  0x61   : > { %s268_s19 = scalar_lea.sflag (!%p1081_p6), [#allocation3], %s988_s0  ;;  %s271_s8 = scalar_lea.vmem (!%p1081_p6), [#allocation2], %s549_s10 }
  0x65   : > { %769 = dma.done.wait (%p1082_p7), %s268_s19, 64  }
  0x66   : > { %771 = vsyncadd (%p1082_p7), %s268_s19, 4294967232  ;;  %s276_s29 = sand.u32 1, %s864_s25   ;;  %s550_s12 = sshll.u32 %s988_s0, 3 }
  0x67   : > { %s277_s13 = scalar_lea.sflag [#allocation6], %s276_s29  ;;  %s280_s7 = scalar_lea.vmem [#allocation5], %s550_s12 }
  0x68   : > { %773 = dma.done.wait (%p1082_p7), %s277_s13, 128  }
  0x69   : > { %775 = vsyncadd (%p1082_p7), %s277_s13, 4294967168  ;;  %p1083_p11 = scmp.eq.s32.totalorder %s864_s25, 0 }
  0x6b   : > { %777 = dma.done.wait (%p1083_p11), [#allocation6], 256   ;;  %p1084_p8 = pmov %p1083_p11 }
  0x6c   : > { %v805_v0 = vmov 0.0   ;;  %vm806_vm0 = vmmov 0   ;;  %v640_v1 = vld [vmem:[#allocation7 + $0x8] sm:$0xff]   ;;  %v641_v2 = vld [vmem:[#allocation7] sm:$0xff]   ;;  %vm343_vm1 = vcmask 261120   ;;  %v387_v6 = vld [vmem:[%s280_s7] sm:$0xff] }
  0x6d   : > { %779 = vsyncadd (%p1084_p8), [#allocation6], 4294967040  ;;  %566 = vmatprep.subr.bf16.mxu0 %v805_v0  ;;  %570 = vmatprep.mubr.msk.bf16.mxu0 %vm806_vm0, %v805_v0  ;;  %v319_v3 = vld [vmem:[%s271_s8] sm:$0xf]  ;;  %s560_s26 = sshll.u32 %s864_s25, 7  ;;  %s317_s30 = scalar_lea.vmem [#allocation8], %s550_s12 }
  0x6e   : > { %567 = vmatpush3.bf16.msra.mxu0 %v640_v1  ;;  %v553_v4 = vld [vmem:[%s1061_s3] ss:$0 sm:$0xff]  ;;  %s438_s2 = sshll.u32 %s317_s30, 4  ;;  %s436_s8 = scalar_lea.hbm %s1064_s6, %s560_s26  ;;  %s439_s2 = int_to_ptr.vmem [resolvable:$true] %s438_s2 }
  0x6f   : > { %568 = vmatprep.subr.bf16.mxu0 %v805_v0  ;;  %v557_v23 = vld [vmem:[%s1062_s4] ss:$0 sm:$0xff]  ;;  %s425_s29 = scalar_lea.sflag [#allocation4], %s988_s0  ;;  %s726_s13 = scalar_lea.vmem %s439_s2, 128 }
  0x70   : > { %v558_v26 = vld [vmem:[%s1063_s5] ss:$0 sm:$0xff]  ;;  %p727_p3 = scmp.ne.s32.totalorder %s439_s2, %s726_s13  ;;  %p1085_p10 = scmp.ne.s32.totalorder %s1077_s18, 0 }
  0x71   : > { %s807_s25 = smov [#allocation8]  }
  0x72   : > { %569 = vmatpush3.bf16.msra.mxu0 %v641_v2  ;;  %p728_p2 = pnand %p727_p3, %p1085_p10  ;;  %s730_s7 = sshll.u32 %s807_s25, 4  ;;  %s731_s7 = int_to_ptr.vmem [resolvable:$false] %s730_s7 }
  0x73   : > { %s732_s12 = scalar_lea.vmem %s731_s7, 256  ;;  %p733_p13 = scmp.lt.s32.totalorder %s439_s2, %s731_s7 }
  0x74   : > { %p729_p12 = pneg %p728_p2  ;;  %p734_p0 = scmp.lt.s32.totalorder %s732_s12, %s726_s13 }
  0x75   : > { %571 = vmatmul.mubr.msk.bf16.vlgmr.msra.gmra.mxu0 %vm343_vm1, %v319_v3 }
  0x76   : > { %p735_p5 = por %p734_p0, %p733_p13 }
  0x78   : > { %p736_p9 = pnand %p735_p5, %p729_p12 }
 0x135   : > { %v381_v5 = vpop.f32.mrf.mxu0 }
 0x136   : > { %v382_v7 = vadd.f32 %v553_v4, %v381_v5 }
 0x137   : > { %v572_v8 = vpop.f32.mrf.mxu0 }
 0x138   : > { %v388_v9 = vadd.f32 %v387_v6, %v382_v7 }
 0x139   : > { %v384_v10 = vpop.f32.mrf.mxu0 }
 0x13a   : > { %v389_v11 = vsel %vm343_vm1, %v388_v9, 0.0  ;;  %v394_v12 = vmul.f32 %v388_v9, %v388_v9 }
 0x13b   : > { %390 = vadd.xlane.f32.xlu0 %v389_v11  ;;  %v573_v13 = vpop.f32.mrf.mxu0 }
 0x13c   : > { %v395_v14 = vsel %vm343_vm1, %v394_v12, 0.0 }
 0x13f   : > { %396 = vadd.xlane.f32.xlu0 %v395_v14 }
 0x1c4   : > { %v391_v15 = vpop.xlane.xlu0 %390 }
 0x1c5   : > { %v393_v16 = vmul.f32 0.03125, %v391_v15 }
 0x1c7   : > { %v399_v18 = vmul.f32 %v393_v16, %v393_v16 }
 0x1c8   : > { %v397_v17 = vpop.xlane.xlu0 %396 }
 0x1c9   : > { %v398_v19 = vmul.f32 0.03125, %v397_v17 }
 0x1cb   : > { %v400_v20 = vsub.f32 %v398_v19, %v399_v18 }
 0x1cd   : > { %v401_v21 = vmax.f32 %v400_v20, 0.0 }
 0x1cf   : > { %v402_v22 = vadd.f32 1e-12, %v401_v21 }
 0x1d1   : > { %642 = vrsqrt.f32 %v402_v22 }
 0x1de   : > { %v643_v24 = vpop.eup %642 }
 0x1df   : > { %v411_v25 = vmul.f32 %v643_v24, %v557_v23 }
 0x1e1   : > { %v413_v27 = vmul.f32 %v411_v25, %v393_v16  ;;  %v421_v29 = vmul.f32 %v411_v25, %v388_v9 }
 0x1e3   : > { %v420_v28 = vsub.f32 %v558_v26, %v413_v27 }
 0x1e5   : > { %v422_v30 = vadd.f32 %v421_v29, %v420_v28 }
 0x1e7   : > { %423 = vst.msk [vmem:[%s317_s30] sm:$0xff] %vm343_vm1, %v422_v30 }
 0x1e8   : > { %739 = shalt.err (!%p736_p9)
}
 0x1e9   : > { %s740_s27 = scalar_lea.hbm %s436_s8, 128  ;;  %s744_s11 = scalar_lea.hbm %s1064_s6, 256 }
 0x1ea   : > { %p741_p1 = scmp.ne.s32.totalorder %s436_s8, %s740_s27  ;;  %p745_p7 = scmp.lt.s32.totalorder %s436_s8, %s1064_s6 }
 0x1eb   : > { %p746_p11 = scmp.lt.s32.totalorder %s744_s11, %s740_s27 }
 0x1ec   : > { %p742_p4 = pnand %p741_p1, %p1085_p10 }
 0x1ed   : > { %p747_p8 = por %p746_p11, %p745_p7 }
 0x1ee   : > { %p743_p6 = pneg %p742_p4 }
 0x1f0   : > { %p748_p3 = pnand %p747_p8, %p743_p6 }
 0x1f2   : > { %751 = shalt.err (!%p748_p3)
}
 0x1f3   : > { %582 = dma.vmem_to_hbm [thread:$0]  (%p1085_p10), %s439_s2, 128, %s436_s8, %s425_s29  }
 0x1f4 PF: > { %s450_s15 = sand.u32 1, %s786_s21   ;;  %p1086_p2 = scmp.ne.s32.totalorder %s1072_s28, 0 }
 0x1f5   : > { %p1087_p12 = scmp.ge.s32.totalorder %s798_s24, 2  ;;  %s451_s26 = scalar_lea.sflag [#allocation4], %s450_s15 }
 0x1f7   : > { %p596_p13 = pnand %p1087_p12, %p1086_p2 }
 0x1f9   : > { %p597_p0 = pneg %p596_p13 }
 0x1fb   : > { %781 = dma.done.wait (%p597_p0), %s451_s26, 128  }
 0x1fc   : > { %783 = vsyncadd (%p597_p0), %s451_s26, 4294967168  ;;  %p22_p5 = scmp.ge.s32.totalorder %s897_s9, 4   ;;  %s1088_s21 = smov %s790_s22 }
 0x1fd   : > { %s1089_s22 = smov %s794_s23  ;;  %s1090_s23 = smov %s914_s17 }
 0x1fe   : > { %s1091_s24 = smov %s897_s9  ;;  %24 = sbr.rel (!%p22_p5) target bundleno = 10 (0xa), region = 106 }
 0x203   :  { %456 = vsyncpa [#allocation3], 1 }
 0x204   :  { %458 = vsyncpa [#allocation3 + $0x1], 1 }
 0x205   :  { %459 = vsyncpa [#allocation6], 1 }
 0x206   :  { %461 = vsyncpa [#allocation6 + $0x1], 1 }
 0x207   :  { %462 = vsyncpa [#allocation4], 1 }
 0x208   :  { %464 = vsyncpa [#allocation4 + $0x1], 1 }

</bundles_post_ra>
